<compile_context>
chip_gen: v7x
topology: tpu7x:2x2x1
jax: 0.10.0
libtpu: 0.0.40
codegen_flags: <defaults>
</compile_context>

<pallas_src>
import jax
import jax.numpy as jnp
from jax import lax
from jax.experimental import pallas as pl
from jax.experimental.pallas import tpu as pltpu


def _round_up(x, m):
    return (x + m - 1) // m * m


def _make_kernel(tb, bb, ip, hp, compute_dtype, unroll):
    """grid=(batch_blocks, time_blocks); time is the innermost, sequential axis."""

    def kernel(x_ref, wi_ref, wh_ref, b_ref, out_ref, h_scratch, xw_scratch):
        # NOTE: this reset is only correct while the time axis is grid axis 1
        # (the innermost / fastest-varying axis). Do not reorder the grid.
        @pl.when(pl.program_id(1) == 0)
        def _():
            h_scratch[...] = jnp.zeros_like(h_scratch)

        # ---- Input projection for the whole time block (independent of the
        # recurrence, so it overlaps with / precedes the serial chain).
        x = x_ref[...].reshape(tb * bb, ip).astype(compute_dtype)
        wi = wi_ref[...].astype(compute_dtype)
        xw = jnp.dot(x, wi, preferred_element_type=jnp.float32)
        xw = xw + b_ref[...].astype(jnp.float32)          # (1, hp) broadcast
        xw_scratch[...] = xw.reshape(tb, bb, hp)

        # ---- Serial recurrence over the TB local timesteps.
        wh = wh_ref[...].astype(compute_dtype)             # loaded once, resident

        def step(i, h):
            pre = xw_scratch[i] + jnp.dot(
                h.astype(compute_dtype), wh, preferred_element_type=jnp.float32
            )
            h_new = jnp.tanh(pre)                          # f32
            out_ref[i] = h_new.astype(out_ref.dtype)       # store in input dtype
            return h_new

        h_scratch[...] = lax.fori_loop(0, tb, step, h_scratch[...], unroll=unroll)

    return kernel


def ctrnn_forward(
    x,
    W_input,
    W_hidden,
    bias,
    *,
    batch_first=False,
    compute_dtype=None,     # set jnp.bfloat16 on v6e/v7x for MXU throughput
    time_block=None,        # target TB; auto-derived from the VMEM budget
    batch_blocks=None,      # set 2 on v7x (2 TensorCores) when padded batch >= 16
    vmem_budget_bytes=20 * 2**20,
):
    """Pallas implementation of CTRNN.forward (num_layers=1, tanh, hx=None)."""
    if batch_first:
        x = jnp.transpose(x, (1, 0, 2))
    T, B, I = x.shape
    H = W_input.shape[0]
    dtype = x.dtype
    compute_dtype = compute_dtype or dtype

    # ---- TPU-friendly padding: lanes (H) -> x128, sublanes (B, I) -> x8. ------
    Hp = _round_up(H, 128)
    Ip = _round_up(I, 8)
    Bp = _round_up(B, 8)

    # ---- Batch blocking. -------------------------------------------------------
    if batch_blocks is not None and batch_blocks > 1:
        BB = _round_up(pl.cdiv(Bp, batch_blocks), 8)
        Bp = _round_up(Bp, BB)
    elif Bp <= 128:
        BB = Bp                      # single batch block (no serial replay of T)
    else:
        # B > 128: pick BB <= 128 trading padded rows against extra batch blocks
        # instead of blindly rounding Bp up to the next multiple of 128.
        def _cost(bb):
            padded = _round_up(Bp, bb)
            return padded + 64 * (padded // bb)
        BB = min(range(8, 129, 8), key=_cost)
        Bp = _round_up(Bp, BB)
    n_b = Bp // BB

    # ---- Time blocking: biggest TB that fits the VMEM slab budget. -------------
    in_bytes = jnp.dtype(dtype).itemsize
    cd_bytes = jnp.dtype(compute_dtype).itemsize

    def _vmem_bytes(tb):
        x_b = 2 * tb * BB * Ip * in_bytes              # double-buffered input tile
        o_b = 2 * tb * BB * Hp * in_bytes              # double-buffered output tile
        w_b = (Ip * Hp + Hp * Hp) * cd_bytes + Hp * 4  # Wi + Wh + bias (single copy)
        s_b = (tb * BB * Hp + BB * Hp) * 4             # xw scratch + resident h (f32)
        return x_b + o_b + w_b + s_b

    TB = max(1, min(time_block or 64, T))
    while TB > 1 and _vmem_bytes(TB) > vmem_budget_bytes:
        TB = max(1, TB // 2)
    Tp = _round_up(T, TB)
    n_t = Tp // TB

    # Cap the unroll when Wh / per-step tiles would blow the 64-vreg budget.
    unroll = min(TB, 16) if (Hp <= 256 and BB <= 64) else min(TB, 4)

    vmem_limit = int(min(max(2 * _vmem_bytes(TB), 32 * 2**20), 48 * 2**20))

    # ---- Zero-padded operands (padded hidden columns stay exactly 0). ----------
    wi_p = jnp.zeros((Ip, Hp), compute_dtype).at[:I, :H].set(
        W_input.T.astype(compute_dtype))
    wh_p = jnp.zeros((Hp, Hp), compute_dtype).at[:H, :H].set(
        W_hidden.T.astype(compute_dtype))
    b_p = jnp.zeros((1, Hp), jnp.float32).at[0, :H].set(bias.astype(jnp.float32))
    x_p = jnp.zeros((Tp, Bp, Ip), dtype).at[:T, :B, :I].set(x)

    grid_spec = pltpu.PrefetchScalarGridSpec(
        num_scalar_prefetch=0,
        grid=(n_b, n_t),
        in_specs=[
            # Raw input tile (TB, BB, Ip) — projected inside the kernel.
            pl.BlockSpec((TB, BB, Ip), lambda b, t: (t, b, 0)),
            # Weights / bias: whole arrays resident in VMEM, single copy.
            pl.BlockSpec(memory_space=pltpu.MemorySpace.VMEM),   # Wi^T
            pl.BlockSpec(memory_space=pltpu.MemorySpace.VMEM),   # Wh^T
            pl.BlockSpec(memory_space=pltpu.MemorySpace.VMEM),   # bias
        ],
        out_specs=pl.BlockSpec((TB, BB, Hp), lambda b, t: (t, b, 0)),
        scratch_shapes=[
            pltpu.VMEM((BB, Hp), jnp.float32),       # hidden state, resident over time
            pltpu.VMEM((TB, BB, Hp), jnp.float32),   # per-block input projection
        ],
    )

    out_p = pl.pallas_call(
        _make_kernel(TB, BB, Ip, Hp, compute_dtype, unroll),
        out_shape=jax.ShapeDtypeStruct((Tp, Bp, Hp), dtype),
        grid_spec=grid_spec,
        compiler_params=pltpu.CompilerParams(
            # batch blocks independent -> megacore shardable (v7x); time carries
            # the recurrence -> sequential.
            dimension_semantics=("parallel", "arbitrary"),
            vmem_limit_bytes=vmem_limit,
        ),
    )(x_p, wi_p, wh_p, b_p)

    out_seq = out_p[:T, :B, :H]                 # strip padding; already input dtype
    output = out_seq[:, None, :, :]             # (T, 1, B, H) — stack of hx per step
    hx = out_seq[-1][None]                      # (1, B, H) — true last hidden state
    if batch_first:
        output = jnp.transpose(output, (1, 0, 2, 3))
    return output, hx


def ctrnn_reference(x, W_input, W_hidden, bias):
    """Plain-JAX reference of the recurrence (time-major x)."""

    def step(h, x_t):
        h_new = jnp.tanh(x_t @ W_input.T + h @ W_hidden.T + bias)
        return h_new, h_new

    h0 = jnp.zeros((x.shape[1], W_input.shape[0]), x.dtype)
    h_last, ys = lax.scan(step, h0, x)
    return ys, h_last


if __name__ == "__main__":
    # Small shapes consistent with the module's example (seq, batch, input) + hidden.
    T, B, I, H = 8, 4, 16, 32
    dtype = jnp.float32

    key = jax.random.PRNGKey(0)
    kx, kwi, kwh, kb = jax.random.split(key, 4)

    # Param init mirroring reset_parameters: U(-1/sqrt(H), 1/sqrt(H)).
    stdv = 1.0 / (H ** 0.5)
    W_input = jax.random.uniform(kwi, (H, I), dtype, minval=-stdv, maxval=stdv)
    W_hidden = jax.random.uniform(kwh, (H, H), dtype, minval=-stdv, maxval=stdv)
    bias = jax.random.uniform(kb, (H,), dtype, minval=-stdv, maxval=stdv)

    x = jax.random.normal(kx, (T, B, I), dtype)

    output, hx = ctrnn_forward(x, W_input, W_hidden, bias, batch_first=False)
    output = jax.block_until_ready(output)
    hx = jax.block_until_ready(hx)

    assert output.shape == (T, 1, B, H), output.shape
    assert hx.shape == (1, B, H), hx.shape

    ref_ys, ref_h = ctrnn_reference(x, W_input, W_hidden, bias)
    # f32 MXU / padded-contraction rounding vs. the XLA reference; tanh-bounded.
    # (If compute_dtype=bf16 is used, relax these tolerances.)
    assert jnp.allclose(output[:, 0], ref_ys, rtol=1e-4, atol=1e-4)
    assert jnp.allclose(hx[0], ref_h, rtol=1e-4, atol=1e-4)

    print("KERNEL_OK")
</pallas_src>

<mosaic_0001>
module attributes {stable_mosaic.version = 11 : i64} {
  func.func @kernel(%arg0: i32, %arg1: i32, %arg2: memref<8x8x16xf32, #tpu.memory_space<vmem>>, %arg3: memref<16x128xf32, #tpu.memory_space<vmem>>, %arg4: memref<128x128xf32, #tpu.memory_space<vmem>>, %arg5: memref<1x128xf32, #tpu.memory_space<vmem>>, %arg6: memref<8x8x128xf32, #tpu.memory_space<vmem>>, %arg7: memref<8x128xf32, #tpu.memory_space<vmem>>, %arg8: memref<8x8x128xf32, #tpu.memory_space<vmem>>) attributes {dimension_semantics = [#tpu.dimension_semantics<parallel>, #tpu.dimension_semantics<arbitrary>], iteration_bounds = array<i64: 1, 1>, scalar_prefetch = 0 : i64, scratch_operands = 2 : i64, tpu.core_type = #tpu.core_type<tc>, window_params = [{transform_indices = @transform_0, window_bounds = array<i64: 8, 8, 16>}, {pipeline_mode = #tpu.pipeline_mode<synchronous>, transform_indices = @transform_1, window_bounds = array<i64: 16, 128>}, {pipeline_mode = #tpu.pipeline_mode<synchronous>, transform_indices = @transform_2, window_bounds = array<i64: 128, 128>}, {pipeline_mode = #tpu.pipeline_mode<synchronous>, transform_indices = @transform_3, window_bounds = array<i64: 1, 128>}, {transform_indices = @transform_4, window_bounds = array<i64: 8, 8, 128>}]} {
    %c0_i32 = arith.constant 0 : i32
    %0 = arith.cmpi eq, %arg1, %c0_i32 : i32
    %1 = arith.extui %0 : i1 to i32
    %c0_i32_0 = arith.constant 0 : i32
    %2 = arith.cmpi ne, %1, %c0_i32_0 : i32
    scf.if %2 {
      %cst_57 = arith.constant 0.000000e+00 : f32
      %95 = vector.broadcast %cst_57 : f32 to vector<8x128xf32>
      %c0_58 = arith.constant 0 : index
      %c0_59 = arith.constant 0 : index
      %96 = vector.load %arg7[%c0_58, %c0_59] : memref<8x128xf32, #tpu.memory_space<vmem>>, vector<8x128xf32>
      tpu.vector_store %arg7[%c0_58, %c0_59], %95 {strides = array<i32>} : memref<8x128xf32, #tpu.memory_space<vmem>>, vector<8x128xf32>,
    } else {
    }
    %c0 = arith.constant 0 : index
    %c0_1 = arith.constant 0 : index
    %c0_2 = arith.constant 0 : index
    %3 = vector.load %arg2[%c0, %c0_1, %c0_2] : memref<8x8x16xf32, #tpu.memory_space<vmem>>, vector<8x8x16xf32>
    %4 = vector.shape_cast %3 : vector<8x8x16xf32> to vector<64x16xf32>
    %c0_3 = arith.constant 0 : index
    %c0_4 = arith.constant 0 : index
    %5 = vector.load %arg3[%c0_3, %c0_4] : memref<16x128xf32, #tpu.memory_space<vmem>>, vector<16x128xf32>
    %cst = arith.constant dense<0.000000e+00> : vector<64x128xf32>
    %6 = tpu.matmul %4, %5, %cst {dimension_numbers = #tpu.dot_dimension_numbers<[1], [0], [0], [1], [0, 0, 1, 1], [], []>} : vector<64x16xf32>, vector<16x128xf32>, vector<64x128xf32> -> vector<64x128xf32>
    %c0_5 = arith.constant 0 : index
    %c0_6 = arith.constant 0 : index
    %7 = vector.load %arg5[%c0_5, %c0_6] : memref<1x128xf32, #tpu.memory_space<vmem>>, vector<1x128xf32>
    %8 = vector.broadcast %7 : vector<1x128xf32> to vector<64x128xf32>
    %9 = arith.addf %6, %8 : vector<64x128xf32>
    %10 = vector.shape_cast %9 : vector<64x128xf32> to vector<8x8x128xf32>
    %c0_7 = arith.constant 0 : index
    %c0_8 = arith.constant 0 : index
    %c0_9 = arith.constant 0 : index
    %11 = vector.load %arg8[%c0_7, %c0_8, %c0_9] : memref<8x8x128xf32, #tpu.memory_space<vmem>>, vector<8x8x128xf32>
    tpu.vector_store %arg8[%c0_7, %c0_8, %c0_9], %10 {strides = array<i32>} : memref<8x8x128xf32, #tpu.memory_space<vmem>>, vector<8x8x128xf32>,
    %c0_10 = arith.constant 0 : index
    %c0_11 = arith.constant 0 : index
    %12 = vector.load %arg4[%c0_10, %c0_11] : memref<128x128xf32, #tpu.memory_space<vmem>>, vector<128x128xf32>
    %c0_12 = arith.constant 0 : index
    %c0_13 = arith.constant 0 : index
    %13 = vector.load %arg7[%c0_12, %c0_13] : memref<8x128xf32, #tpu.memory_space<vmem>>, vector<8x128xf32>
    %c0_i32_14 = arith.constant 0 : i32
    %14 = arith.index_cast %c0_i32_14 : i32 to index
    %c0_15 = arith.constant 0 : index
    %c0_16 = arith.constant 0 : index
    %15 = vector.load %arg8[%14, %c0_15, %c0_16] : memref<8x8x128xf32, #tpu.memory_space<vmem>>, vector<1x8x128xf32>
    %16 = vector.shape_cast %15 : vector<1x8x128xf32> to vector<8x128xf32>
    %cst_17 = arith.constant dense<0.000000e+00> : vector<8x128xf32>
    %17 = tpu.matmul %13, %12, %cst_17 {dimension_numbers = #tpu.dot_dimension_numbers<[1], [0], [0], [1], [0, 0, 1, 1], [], []>} : vector<8x128xf32>, vector<128x128xf32>, vector<8x128xf32> -> vector<8x128xf32>
    %18 = arith.addf %16, %17 : vector<8x128xf32>
    %19 = math.tanh %18 : vector<8x128xf32>
    %20 = arith.index_cast %c0_i32_14 : i32 to index
    %c0_18 = arith.constant 0 : index
    %c0_19 = arith.constant 0 : index
    %21 = vector.load %arg6[%20, %c0_18, %c0_19] : memref<8x8x128xf32, #tpu.memory_space<vmem>>, vector<1x8x128xf32>
    %22 = vector.shape_cast %21 : vector<1x8x128xf32> to vector<8x128xf32>
    %23 = vector.shape_cast %19 : vector<8x128xf32> to vector<1x8x128xf32>
    tpu.vector_store %arg6[%20, %c0_18, %c0_19], %23 {strides = array<i32>} : memref<8x8x128xf32, #tpu.memory_space<vmem>>, vector<1x8x128xf32>,
    %c1_i32 = arith.constant 1 : i32
    %24 = arith.index_cast %c1_i32 : i32 to index
    %c0_20 = arith.constant 0 : index
    %c0_21 = arith.constant 0 : index
    %25 = vector.load %arg8[%24, %c0_20, %c0_21] : memref<8x8x128xf32, #tpu.memory_space<vmem>>, vector<1x8x128xf32>
    %26 = vector.shape_cast %25 : vector<1x8x128xf32> to vector<8x128xf32>
    %cst_22 = arith.constant dense<0.000000e+00> : vector<8x128xf32>
    %27 = tpu.matmul %19, %12, %cst_22 {dimension_numbers = #tpu.dot_dimension_numbers<[1], [0], [0], [1], [0, 0, 1, 1], [], []>} : vector<8x128xf32>, vector<128x128xf32>, vector<8x128xf32> -> vector<8x128xf32>
    %28 = arith.addf %26, %27 : vector<8x128xf32>
    %29 = math.tanh %28 : vector<8x128xf32>
    %30 = arith.index_cast %c1_i32 : i32 to index
    %c0_23 = arith.constant 0 : index
    %c0_24 = arith.constant 0 : index
    %31 = vector.load %arg6[%30, %c0_23, %c0_24] : memref<8x8x128xf32, #tpu.memory_space<vmem>>, vector<1x8x128xf32>
    %32 = vector.shape_cast %31 : vector<1x8x128xf32> to vector<8x128xf32>
    %33 = vector.shape_cast %29 : vector<8x128xf32> to vector<1x8x128xf32>
    tpu.vector_store %arg6[%30, %c0_23, %c0_24], %33 {strides = array<i32>} : memref<8x8x128xf32, #tpu.memory_space<vmem>>, vector<1x8x128xf32>,
    %c2_i32 = arith.constant 2 : i32
    %34 = arith.index_cast %c2_i32 : i32 to index
    %c0_25 = arith.constant 0 : index
    %c0_26 = arith.constant 0 : index
    %35 = vector.load %arg8[%34, %c0_25, %c0_26] : memref<8x8x128xf32, #tpu.memory_space<vmem>>, vector<1x8x128xf32>
    %36 = vector.shape_cast %35 : vector<1x8x128xf32> to vector<8x128xf32>
    %cst_27 = arith.constant dense<0.000000e+00> : vector<8x128xf32>
    %37 = tpu.matmul %29, %12, %cst_27 {dimension_numbers = #tpu.dot_dimension_numbers<[1], [0], [0], [1], [0, 0, 1, 1], [], []>} : vector<8x128xf32>, vector<128x128xf32>, vector<8x128xf32> -> vector<8x128xf32>
    %38 = arith.addf %36, %37 : vector<8x128xf32>
    %39 = math.tanh %38 : vector<8x128xf32>
    %40 = arith.index_cast %c2_i32 : i32 to index
    %c0_28 = arith.constant 0 : index
    %c0_29 = arith.constant 0 : index
    %41 = vector.load %arg6[%40, %c0_28, %c0_29] : memref<8x8x128xf32, #tpu.memory_space<vmem>>, vector<1x8x128xf32>
    %42 = vector.shape_cast %41 : vector<1x8x128xf32> to vector<8x128xf32>
    %43 = vector.shape_cast %39 : vector<8x128xf32> to vector<1x8x128xf32>
    tpu.vector_store %arg6[%40, %c0_28, %c0_29], %43 {strides = array<i32>} : memref<8x8x128xf32, #tpu.memory_space<vmem>>, vector<1x8x128xf32>,
    %c3_i32 = arith.constant 3 : i32
    %44 = arith.index_cast %c3_i32 : i32 to index
    %c0_30 = arith.constant 0 : index
    %c0_31 = arith.constant 0 : index
    %45 = vector.load %arg8[%44, %c0_30, %c0_31] : memref<8x8x128xf32, #tpu.memory_space<vmem>>, vector<1x8x128xf32>
    %46 = vector.shape_cast %45 : vector<1x8x128xf32> to vector<8x128xf32>
    %cst_32 = arith.constant dense<0.000000e+00> : vector<8x128xf32>
    %47 = tpu.matmul %39, %12, %cst_32 {dimension_numbers = #tpu.dot_dimension_numbers<[1], [0], [0], [1], [0, 0, 1, 1], [], []>} : vector<8x128xf32>, vector<128x128xf32>, vector<8x128xf32> -> vector<8x128xf32>
    %48 = arith.addf %46, %47 : vector<8x128xf32>
    %49 = math.tanh %48 : vector<8x128xf32>
    %50 = arith.index_cast %c3_i32 : i32 to index
    %c0_33 = arith.constant 0 : index
    %c0_34 = arith.constant 0 : index
    %51 = vector.load %arg6[%50, %c0_33, %c0_34] : memref<8x8x128xf32, #tpu.memory_space<vmem>>, vector<1x8x128xf32>
    %52 = vector.shape_cast %51 : vector<1x8x128xf32> to vector<8x128xf32>
    %53 = vector.shape_cast %49 : vector<8x128xf32> to vector<1x8x128xf32>
    tpu.vector_store %arg6[%50, %c0_33, %c0_34], %53 {strides = array<i32>} : memref<8x8x128xf32, #tpu.memory_space<vmem>>, vector<1x8x128xf32>,
    %c4_i32 = arith.constant 4 : i32
    %54 = arith.index_cast %c4_i32 : i32 to index
    %c0_35 = arith.constant 0 : index
    %c0_36 = arith.constant 0 : index
    %55 = vector.load %arg8[%54, %c0_35, %c0_36] : memref<8x8x128xf32, #tpu.memory_space<vmem>>, vector<1x8x128xf32>
    %56 = vector.shape_cast %55 : vector<1x8x128xf32> to vector<8x128xf32>
    %cst_37 = arith.constant dense<0.000000e+00> : vector<8x128xf32>
    %57 = tpu.matmul %49, %12, %cst_37 {dimension_numbers = #tpu.dot_dimension_numbers<[1], [0], [0], [1], [0, 0, 1, 1], [], []>} : vector<8x128xf32>, vector<128x128xf32>, vector<8x128xf32> -> vector<8x128xf32>
    %58 = arith.addf %56, %57 : vector<8x128xf32>
    %59 = math.tanh %58 : vector<8x128xf32>
    %60 = arith.index_cast %c4_i32 : i32 to index
    %c0_38 = arith.constant 0 : index
    %c0_39 = arith.constant 0 : index
    %61 = vector.load %arg6[%60, %c0_38, %c0_39] : memref<8x8x128xf32, #tpu.memory_space<vmem>>, vector<1x8x128xf32>
    %62 = vector.shape_cast %61 : vector<1x8x128xf32> to vector<8x128xf32>
    %63 = vector.shape_cast %59 : vector<8x128xf32> to vector<1x8x128xf32>
    tpu.vector_store %arg6[%60, %c0_38, %c0_39], %63 {strides = array<i32>} : memref<8x8x128xf32, #tpu.memory_space<vmem>>, vector<1x8x128xf32>,
    %c5_i32 = arith.constant 5 : i32
    %64 = arith.index_cast %c5_i32 : i32 to index
    %c0_40 = arith.constant 0 : index
    %c0_41 = arith.constant 0 : index
    %65 = vector.load %arg8[%64, %c0_40, %c0_41] : memref<8x8x128xf32, #tpu.memory_space<vmem>>, vector<1x8x128xf32>
    %66 = vector.shape_cast %65 : vector<1x8x128xf32> to vector<8x128xf32>
    %cst_42 = arith.constant dense<0.000000e+00> : vector<8x128xf32>
    %67 = tpu.matmul %59, %12, %cst_42 {dimension_numbers = #tpu.dot_dimension_numbers<[1], [0], [0], [1], [0, 0, 1, 1], [], []>} : vector<8x128xf32>, vector<128x128xf32>, vector<8x128xf32> -> vector<8x128xf32>
    %68 = arith.addf %66, %67 : vector<8x128xf32>
    %69 = math.tanh %68 : vector<8x128xf32>
    %70 = arith.index_cast %c5_i32 : i32 to index
    %c0_43 = arith.constant 0 : index
    %c0_44 = arith.constant 0 : index
    %71 = vector.load %arg6[%70, %c0_43, %c0_44] : memref<8x8x128xf32, #tpu.memory_space<vmem>>, vector<1x8x128xf32>
    %72 = vector.shape_cast %71 : vector<1x8x128xf32> to vector<8x128xf32>
    %73 = vector.shape_cast %69 : vector<8x128xf32> to vector<1x8x128xf32>
    tpu.vector_store %arg6[%70, %c0_43, %c0_44], %73 {strides = array<i32>} : memref<8x8x128xf32, #tpu.memory_space<vmem>>, vector<1x8x128xf32>,
    %c6_i32 = arith.constant 6 : i32
    %74 = arith.index_cast %c6_i32 : i32 to index
    %c0_45 = arith.constant 0 : index
    %c0_46 = arith.constant 0 : index
    %75 = vector.load %arg8[%74, %c0_45, %c0_46] : memref<8x8x128xf32, #tpu.memory_space<vmem>>, vector<1x8x128xf32>
    %76 = vector.shape_cast %75 : vector<1x8x128xf32> to vector<8x128xf32>
    %cst_47 = arith.constant dense<0.000000e+00> : vector<8x128xf32>
    %77 = tpu.matmul %69, %12, %cst_47 {dimension_numbers = #tpu.dot_dimension_numbers<[1], [0], [0], [1], [0, 0, 1, 1], [], []>} : vector<8x128xf32>, vector<128x128xf32>, vector<8x128xf32> -> vector<8x128xf32>
    %78 = arith.addf %76, %77 : vector<8x128xf32>
    %79 = math.tanh %78 : vector<8x128xf32>
    %80 = arith.index_cast %c6_i32 : i32 to index
    %c0_48 = arith.constant 0 : index
    %c0_49 = arith.constant 0 : index
    %81 = vector.load %arg6[%80, %c0_48, %c0_49] : memref<8x8x128xf32, #tpu.memory_space<vmem>>, vector<1x8x128xf32>
    %82 = vector.shape_cast %81 : vector<1x8x128xf32> to vector<8x128xf32>
    %83 = vector.shape_cast %79 : vector<8x128xf32> to vector<1x8x128xf32>
    tpu.vector_store %arg6[%80, %c0_48, %c0_49], %83 {strides = array<i32>} : memref<8x8x128xf32, #tpu.memory_space<vmem>>, vector<1x8x128xf32>,
    %c7_i32 = arith.constant 7 : i32
    %84 = arith.index_cast %c7_i32 : i32 to index
    %c0_50 = arith.constant 0 : index
    %c0_51 = arith.constant 0 : index
    %85 = vector.load %arg8[%84, %c0_50, %c0_51] : memref<8x8x128xf32, #tpu.memory_space<vmem>>, vector<1x8x128xf32>
    %86 = vector.shape_cast %85 : vector<1x8x128xf32> to vector<8x128xf32>
    %cst_52 = arith.constant dense<0.000000e+00> : vector<8x128xf32>
    %87 = tpu.matmul %79, %12, %cst_52 {dimension_numbers = #tpu.dot_dimension_numbers<[1], [0], [0], [1], [0, 0, 1, 1], [], []>} : vector<8x128xf32>, vector<128x128xf32>, vector<8x128xf32> -> vector<8x128xf32>
    %88 = arith.addf %86, %87 : vector<8x128xf32>
    %89 = math.tanh %88 : vector<8x128xf32>
    %90 = arith.index_cast %c7_i32 : i32 to index
    %c0_53 = arith.constant 0 : index
    %c0_54 = arith.constant 0 : index
    %91 = vector.load %arg6[%90, %c0_53, %c0_54] : memref<8x8x128xf32, #tpu.memory_space<vmem>>, vector<1x8x128xf32>
    %92 = vector.shape_cast %91 : vector<1x8x128xf32> to vector<8x128xf32>
    %93 = vector.shape_cast %89 : vector<8x128xf32> to vector<1x8x128xf32>
    tpu.vector_store %arg6[%90, %c0_53, %c0_54], %93 {strides = array<i32>} : memref<8x8x128xf32, #tpu.memory_space<vmem>>, vector<1x8x128xf32>,
    %c8_i32 = arith.constant 8 : i32
    %c0_55 = arith.constant 0 : index
    %c0_56 = arith.constant 0 : index
    %94 = vector.load %arg7[%c0_55, %c0_56] : memref<8x128xf32, #tpu.memory_space<vmem>>, vector<8x128xf32>
    tpu.vector_store %arg7[%c0_55, %c0_56], %89 {strides = array<i32>} : memref<8x128xf32, #tpu.memory_space<vmem>>, vector<8x128xf32>,
    return
  }
  func.func @transform_0(%arg0: i32, %arg1: i32) -> (i32, i32, i32) {
    %c0_i32 = arith.constant 0 : i32
    %c0_i32_0 = arith.constant 0 : i32
    return %arg1, %arg0, %c0_i32 : i32, i32, i32
  }
  func.func @transform_1(%arg0: i32, %arg1: i32) -> (i32, i32) {
    %c0_i32 = arith.constant 0 : i32
    %c0_i32_0 = arith.constant 0 : i32
    %c0_i32_1 = arith.constant 0 : i32
    return %c0_i32, %c0_i32_0 : i32, i32
  }
  func.func @transform_2(%arg0: i32, %arg1: i32) -> (i32, i32) {
    %c0_i32 = arith.constant 0 : i32
    %c0_i32_0 = arith.constant 0 : i32
    %c0_i32_1 = arith.constant 0 : i32
    return %c0_i32, %c0_i32_0 : i32, i32
  }
  func.func @transform_3(%arg0: i32, %arg1: i32) -> (i32, i32) {
    %c0_i32 = arith.constant 0 : i32
    %c0_i32_0 = arith.constant 0 : i32
    %c0_i32_1 = arith.constant 0 : i32
    return %c0_i32, %c0_i32_0 : i32, i32
  }
  func.func @transform_4(%arg0: i32, %arg1: i32) -> (i32, i32, i32) {
    %c0_i32 = arith.constant 0 : i32
    %c0_i32_0 = arith.constant 0 : i32
    return %arg1, %arg0, %c0_i32 : i32, i32, i32
  }
}

</mosaic_0001>

<bundles_post_ra>
// kernel: tpu_custom_call.1
= control target key start
LH: loop header
LB: loop body
LE: loop exit
PB: predicated region body
PF: predicated region fallthrough
CT: control target
= control target key end

     0   :  { %9 = vsyncpa [#allocation5], 0  ;;  %s1922_s0 = inlined_call_operand.hbm [shape: f32[8,8,16], index: 0, kind: input, shape index: {}]   ;;  %s1923_s1 = inlined_call_operand.hbm [shape: f32[16,128], index: 1, kind: input, shape index: {}]   ;;  %s1924_s2 = inlined_call_operand.hbm [shape: f32[128,128], index: 2, kind: input, shape index: {}]   ;;  %s1925_s3 = inlined_call_operand.vmem [shape: f32[1,128], index: 3, kind: input, shape index: {}]   ;;  %s1926_s4 = inlined_call_operand.hbm [shape: f32[8,8,128], index: 4, kind: output, shape index: {}]  }
   0x1   :  { %10 = vsyncpa [#allocation8], 0 }
   0x2   :  { %11 = vsyncpa [#allocation6], 0  ;;  %s1627_s15 = smov [#allocation7]   ;;  %s1628_s17 = smov [#allocation4]  }
   0x3   :  { %s29_s16 = sshll.u32 %s1627_s15, 4  ;;  %s17_s18 = sshll.u32 %s1628_s17, 4  ;;  %s30_s16 = int_to_ptr.vmem [resolvable:$true] %s29_s16  ;;  %s1661_s18 = int_to_ptr.vmem [resolvable:$true] %s17_s18 }
   0x4   :  { %s1533_s21 = scalar_lea.hbm %s1923_s1, 256 }
   0x5   :  { %p1534_p0 = scmp.ne.s32.totalorder %s1923_s1, %s1533_s21  ;;  %p1537_p1 = scmp.lt.u32.totalorder %s1533_s21, %s1923_s1 }
   0x7   :  { %p1539_p2 = pnand %p1537_p1, %p1534_p0 }
   0x9   :  { %1542 = shalt.err (!%p1539_p2)
}
   0xa   :  { %s1543_s26 = scalar_lea.vmem %s30_s16, 256  ;;  %p1548_p4 = scmp.lt.s32.totalorder %s30_s16, %s30_s16 }
   0xb   :  { %p1544_p3 = scmp.ne.s32.totalorder %s30_s16, %s1543_s26  ;;  %p1549_p5 = scmp.lt.s32.totalorder %s1543_s26, %s1543_s26 }
   0xd   :  { %p1550_p6 = por %p1549_p5, %p1548_p4 }
   0xf   :  { %p1551_p7 = pnand %p1550_p6, %p1544_p3 }
  0x11   :  { %1554 = shalt.err (!%p1551_p7)
}
  0x12   :  { %s1629_s27 = smov 128   ;;  %s1630_s28 = smov 8  }
  0x13   :  { %35 = dma.hbm_to_vmem [thread:$0]  %s1923_s1, 256, %s30_s16, [#allocation8], %s1629_s27, %s1629_s27, %s1630_s28  }
  0x14   :  { %s1555_s7 = scalar_lea.hbm %s1922_s0, 1024 }
  0x15   :  { %p1556_p8 = scmp.ne.s32.totalorder %s1922_s0, %s1555_s7  ;;  %p1559_p9 = scmp.lt.u32.totalorder %s1555_s7, %s1922_s0 }
  0x17   :  { %p1561_p10 = pnand %p1559_p9, %p1556_p8 }
  0x19   :  { %1564 = shalt.err (!%p1561_p10)
}
  0x1a   :  { %s1565_s12 = scalar_lea.vmem %s1661_s18, 1024  ;;  %p1570_p12 = scmp.lt.s32.totalorder %s1661_s18, %s1661_s18 }
  0x1b   :  { %p1566_p11 = scmp.ne.s32.totalorder %s1661_s18, %s1565_s12  ;;  %p1571_p13 = scmp.lt.s32.totalorder %s1565_s12, %s1565_s12 }
  0x1d   :  { %p1572_p0 = por %p1571_p13, %p1570_p12 }
  0x1f   :  { %p1573_p1 = pnand %p1572_p0, %p1566_p11 }
  0x21   :  { %1576 = shalt.err (!%p1573_p1)
}
  0x22   :  { %23 = dma.hbm_to_vmem [thread:$0]  %s1922_s0, 1024, %s1661_s18, [#allocation5], %s1629_s27, %s1629_s27, %s1630_s28  }
  0x23   :  { %s1631_s14 = smov [#allocation9]   ;;  %s1577_s19 = scalar_lea.hbm %s1924_s2, 2048 }
  0x24   :  { %s41_s15 = sshll.u32 %s1631_s14, 4  ;;  %p1578_p2 = scmp.ne.s32.totalorder %s1924_s2, %s1577_s19  ;;  %s42_s15 = int_to_ptr.vmem [resolvable:$true] %s41_s15 }
  0x25   :  { %p1581_p3 = scmp.lt.u32.totalorder %s1577_s19, %s1924_s2 }
  0x27   :  { %p1583_p4 = pnand %p1581_p3, %p1578_p2 }
  0x29   :  { %1586 = shalt.err (!%p1583_p4)
}
  0x2a   :  { %s1587_s24 = scalar_lea.vmem %s42_s15, 2048  ;;  %p1592_p6 = scmp.lt.s32.totalorder %s42_s15, %s42_s15 }
  0x2b   :  { %p1588_p5 = scmp.ne.s32.totalorder %s42_s15, %s1587_s24  ;;  %p1593_p7 = scmp.lt.s32.totalorder %s1587_s24, %s1587_s24 }
  0x2d   :  { %p1594_p8 = por %p1593_p7, %p1592_p6 }
  0x2f   :  { %p1595_p9 = pnand %p1594_p8, %p1588_p5 }
  0x31   :  { %1598 = shalt.err (!%p1595_p9)
}
  0x32   :  { %47 = dma.hbm_to_vmem [thread:$0]  %s1924_s2, 2048, %s42_s15, [#allocation8], %s1629_s27, %s1629_s27, %s1630_s28  }
  0x33   :  { %1621 = dma.done.wait [#allocation5], 1024  }
  0x34   :  { %1622 = vsyncadd [#allocation5], 4294966272 }
  0x35   :  { %1623 = dma.done.wait [#allocation8], 2304  }
  0x36   :  { %1624 = vsyncadd [#allocation8], 4294964992  ;;  %v1632_v0 = vmov 0.0|0.0   ;;  %vm1633_vm0 = vmmov 0   ;;  %v1634_v1 = vmov 0.0   ;;  %v219_v2 = vld [vmem:[#allocation9] sm:$0xff] }
  0x37   :  { %1316 = vmatprep.subr.bf16.mxu1 %v1632_v0  ;;  %1064 = vmatprep.mubr.msk.f32.mxu1 %vm1633_vm0, %v1634_v1  ;;  %v220_v3 = vld [vmem:[#allocation9 + $0x8] sm:$0xff]  ;;  %v221_v4 = vld [vmem:[#allocation9 + $0x10] sm:$0xff]  ;;  %v222_v6 = vld [vmem:[#allocation9 + $0x18] sm:$0xff]  ;;  %vm81_vm1 = vcmask 130048  }
  0x38   :  { %v1716_v5 = vpack.c.bf16 %v220_v3, %v219_v2  ;;  %v1719_v7 = vpack.c.bf16 %v222_v6, %v221_v4  ;;  %v223_v8 = vld [vmem:[#allocation9 + $0x20] sm:$0xff]  ;;  %v224_v9 = vld [vmem:[#allocation9 + $0x28] sm:$0xff]  ;;  %v72_v10 = vld [vmem:[#allocation7] sm:$0xff] }
  0x39   :  { %v73_v11 = vld [vmem:[#allocation7 + $0x8] sm:$0xff]  ;;  %v64_v13 = vld [vmem:[#allocation4] sm:$0xff]  ;;  %v1724_v14 = vpack.c.bf16 %v224_v9, %v223_v8  ;;  %v227_v19 = vld [vmem:[#allocation9 + $0x40] sm:$0xff] }
  0x3a   :  { %1318 = vmatpush3.bf16.msra.mxu1 %v1716_v5  ;;  %v1312_v12 = vpack.c.bf16 %v73_v11, %v72_v10  ;;  %1020 = vmatprep.mubr.msk.f32.mxu0 %vm81_vm1, %v64_v13  ;;  %v225_v15 = vld [vmem:[#allocation9 + $0x30] sm:$0xff]  ;;  %v226_v16 = vld [vmem:[#allocation9 + $0x38] sm:$0xff]  ;;  %v228_v20 = vld [vmem:[#allocation9 + $0x48] sm:$0xff] }
  0x3b   :  { %1319 = vmatprep.subr.bf16.mxu1 %v1632_v0  ;;  %v65_v17 = vld [vmem:[#allocation4 + $0x8] sm:$0xff]  ;;  %v1729_v18 = vpack.c.bf16 %v226_v16, %v225_v15  ;;  %v1736_v21 = vpack.c.bf16 %v228_v20, %v227_v19  ;;  %v229_v22 = vld [vmem:[#allocation9 + $0x50] sm:$0xff]  ;;  %v231_v25 = vld [vmem:[#allocation9 + $0x60] sm:$0xff] }
  0x3c   :  { %1313 = vmatprep.subr.bf16.mxu0 %v1312_v12  ;;  %v230_v23 = vld [vmem:[#allocation9 + $0x58] sm:$0xff]  ;;  %v232_v26 = vld [vmem:[#allocation9 + $0x68] sm:$0xff]  ;;  %v233_v28 = vld [vmem:[#allocation9 + $0x70] sm:$0xff] }
  0x3d   :  { %1315 = vmatpush3.bf16.msra.mxu0 %v1312_v12  ;;  %v1742_v24 = vpack.c.bf16 %v230_v23, %v229_v22  ;;  %v1748_v27 = vpack.c.bf16 %v232_v26, %v231_v25  ;;  %v234_v29 = vld [vmem:[#allocation9 + $0x78] sm:$0xff]  ;;  %v66_v31 = vld [vmem:[#allocation4 + $0x10] sm:$0xff]  ;;  %v67_v32 = vld [vmem:[#allocation4 + $0x18] sm:$0xff] }
  0x3e   :  { %1321 = vmatpush3.bf16.msra.mxu1 %v1719_v7  ;;  %1340 = vmatprep.subr.bf16.mxu0 %v1632_v0  ;;  %v1754_v30 = vpack.c.bf16 %v234_v29, %v233_v28  ;;  %v68_v33 = vld [vmem:[#allocation4 + $0x20] sm:$0xff]  ;;  %v69_v34 = vld [vmem:[#allocation4 + $0x28] sm:$0xff]  ;;  %v70_v35 = vld [vmem:[#allocation4 + $0x30] sm:$0xff] }
  0x3f   :  { %1322 = vmatprep.subr.bf16.mxu1 %v1632_v0  ;;  %v71_v36 = vld [vmem:[#allocation4 + $0x38] sm:$0xff]  ;;  %v1797_v39 = vld [vmem:[%s1925_s3] ss:$0 sm:$0xff]  ;;  %s1635_s3 = smov [#allocation10]  }
  0x40   :  { %1021 = vmatmul.mubr.msk.f32.vlgmr.msra.gmra.mrb[0].mxu0 %vm81_vm1, %v65_v17  ;;  %s848_s26 = sshll.u32 %s1635_s3, 4  ;;  %s849_s26 = int_to_ptr.vmem [resolvable:$true] %s848_s26 }
  0x41   :  { %1342 = vmatpush3.bf16.msra.mxu0 %v1716_v5  ;;  %1023 = vmatprep.mubr.msk.f32.mxu0 %vm81_vm1, %v66_v31  ;;  %s1599_s29 = scalar_lea.vmem %s849_s26, 1024  ;;  %p1604_p11 = scmp.lt.s32.totalorder %s849_s26, %s849_s26 }
  0x42   :  { %1324 = vmatpush3.bf16.msra.mxu1 %v1724_v14  ;;  %1343 = vmatprep.subr.bf16.mxu0 %v1632_v0  ;;  %p1600_p10 = scmp.ne.s32.totalorder %s849_s26, %s1599_s29  ;;  %p1605_p12 = scmp.lt.s32.totalorder %s1599_s29, %s1599_s29 }
  0x43   :  { %1325 = vmatprep.subr.bf16.mxu1 %v1632_v0 }
  0x44   :  { %1024 = vmatmul.mubr.msk.f32.gmra.mrb[2].mxu0 %vm81_vm1, %v67_v32  ;;  %p1606_p13 = por %p1605_p12, %p1604_p11 }
  0x45   :  { %1345 = vmatpush3.bf16.msra.mxu0 %v1719_v7  ;;  %1026 = vmatprep.mubr.msk.f32.mxu0 %vm81_vm1, %v68_v33 }
  0x46   :  { %1327 = vmatpush3.bf16.msra.mxu1 %v1729_v18  ;;  %1346 = vmatprep.subr.bf16.mxu0 %v1632_v0  ;;  %p1607_p0 = pnand %p1606_p13, %p1600_p10 }
  0x47   :  { %1328 = vmatprep.subr.bf16.mxu1 %v1632_v0 }
  0x48   :  { %1027 = vmatmul.mubr.msk.f32.gmra.mrb[4].mxu0 %vm81_vm1, %v69_v34 }
  0x49   :  { %1348 = vmatpush3.bf16.msra.mxu0 %v1724_v14  ;;  %1029 = vmatprep.mubr.msk.f32.mxu0 %vm81_vm1, %v70_v35 }
  0x4a   :  { %1330 = vmatpush3.bf16.msra.mxu1 %v1736_v21  ;;  %1349 = vmatprep.subr.bf16.mxu0 %v1632_v0 }
  0x4b   :  { %1331 = vmatprep.subr.bf16.mxu1 %v1632_v0 }
  0x4c   :  { %1030 = vmatmul.mubr.msk.f32.gmra.mrb[6].mxu0 %vm81_vm1, %v71_v36 }
  0x4d   :  { %1351 = vmatpush3.bf16.msra.mxu0 %v1729_v18  ;;  %1099 = vmatprep.mubr.msk.f32.mxu0 %vm1633_vm0, %v1634_v1 }
  0x4e   :  { %1333 = vmatpush3.bf16.msra.mxu1 %v1742_v24  ;;  %1352 = vmatprep.subr.bf16.mxu0 %v1632_v0 }
  0x4f   :  { %1334 = vmatprep.subr.bf16.mxu1 %v1632_v0 }
  0x51   :  { %1354 = vmatpush3.bf16.msra.mxu0 %v1736_v21 }
  0x52   :  { %1336 = vmatpush3.bf16.msra.mxu1 %v1748_v27  ;;  %1355 = vmatprep.subr.bf16.mxu0 %v1632_v0 }
  0x53   :  { %1337 = vmatprep.subr.bf16.mxu1 %v1632_v0 }
  0x55   :  { %1357 = vmatpush3.bf16.msra.mxu0 %v1742_v24 }
  0x56   :  { %1339 = vmatpush3.bf16.msra.mxu1 %v1754_v30  ;;  %1358 = vmatprep.subr.bf16.mxu0 %v1632_v0 }
  0x57   :  { %1364 = vmatprep.subr.bf16.mxu1 %v1632_v0 }
  0x59   :  { %1065 = vmatmul.mubr.f32.vlgmr.msra.gmra.mrb[0].mxu1 %v1634_v1  ;;  %1360 = vmatpush3.bf16.msra.mxu0 %v1748_v27 }
  0x5a   :  { %1366 = vmatpush3.bf16.msra.mxu1 %v1716_v5  ;;  %1134 = vmatprep.mubr.msk.f32.mxu1 %vm1633_vm0, %v1634_v1 }
  0x5b   :  { %1367 = vmatprep.subr.bf16.mxu1 %v1632_v0  ;;  %1361 = vmatprep.subr.bf16.mxu0 %v1632_v0 }
  0x5d   :  { %1363 = vmatpush3.bf16.msra.mxu0 %v1754_v30 }
  0x5e   :  { %1369 = vmatpush3.bf16.msra.mxu1 %v1719_v7  ;;  %1388 = vmatprep.subr.bf16.mxu0 %v1632_v0 }
  0x5f   :  { %1370 = vmatprep.subr.bf16.mxu1 %v1632_v0 }
  0x62   :  { %1372 = vmatpush3.bf16.msra.mxu1 %v1724_v14 }
  0x63   :  { %1373 = vmatprep.subr.bf16.mxu1 %v1632_v0 }
  0x66   :  { %1375 = vmatpush3.bf16.msra.mxu1 %v1729_v18 }
  0x67   :  { %1376 = vmatprep.subr.bf16.mxu1 %v1632_v0 }
  0x6a   :  { %1378 = vmatpush3.bf16.msra.mxu1 %v1736_v21 }
  0x6b   :  { %1379 = vmatprep.subr.bf16.mxu1 %v1632_v0 }
  0x6e   :  { %1381 = vmatpush3.bf16.msra.mxu1 %v1742_v24 }
  0x6f   :  { %1382 = vmatprep.subr.bf16.mxu1 %v1632_v0 }
  0x72   :  { %1384 = vmatpush3.bf16.msra.mxu1 %v1748_v27 }
  0x73   :  { %1385 = vmatprep.subr.bf16.mxu1 %v1632_v0 }
  0x76   :  { %1387 = vmatpush3.bf16.msra.mxu1 %v1754_v30 }
  0x77   :  { %1412 = vmatprep.subr.bf16.mxu1 %v1632_v0 }
 0x113   :  { %v1022_v37 = vpop.f32.mrb[0].mxu0 }
 0x114   :  { %v172_v38 = vpop.f32.mrb[1].mxu0  ;;  %v178_v51 = vadd.f32 %v1022_v37, %v1797_v39 }
 0x115   :  { %v173_v40 = vadd.f32 %v1797_v39, %v172_v38 }
 0x117   :  { %v1025_v45 = vpop.f32.mrb[2].mxu0 }
 0x118   :  { %v182_v46 = vpop.f32.mrb[3].mxu0  ;;  %v188_v61 = vadd.f32 %v1025_v45, %v1797_v39 }
 0x119   :  { %v183_v56 = vadd.f32 %v1797_v39, %v182_v46 }
 0x11b   :  { %v1818_v47 = vpop.f32.mrb[4].mxu0 }
 0x11c   :  { %v1820_v48 = vpop.f32.mrb[5].mxu0 }
 0x11d   :  { %v193_v4 = vadd.f32 %v1797_v39, %v1820_v48 }
 0x11f   :  { %v1822_v49 = vpop.f32.mrb[6].mxu0 }
 0x120   :  { %v1824_v50 = vpop.f32.mrb[7].mxu0  ;;  %v208_v17 = vadd.f32 %v1822_v49, %v1797_v39 }
 0x121   :  { %v203_v13 = vadd.f32 %v1797_v39, %v1824_v50 }
 0x12c   :  { %v303_v41 = vpop.f32.mrb[0].mxu1 }
 0x12d   :  { %v307_v42 = vadd.f32 %v303_v41, %v173_v40  ;;  %v1066_v43 = vpop.f32.mrb[1].mxu1 }
 0x12f   :  { %1517 = vtanh.f32 %v307_v42 }
 0x139   :  { %v1518_v44 = vpop.eup %1517 }
 0x13a   :  { %309 = vst [vmem:[#allocation10] sm:$0xff] %v1518_v44  ;;  %1100 = vmatmul.mubr.f32.vlgmr.msra.gmra.mrb[8].mxu0 %v1518_v44 }
 0x13b   :  { %1390 = vmatpush3.bf16.msra.mxu0 %v1716_v5  ;;  %1169 = vmatprep.mubr.msk.f32.mxu0 %vm1633_vm0, %v1634_v1 }
 0x13c   :  { %1391 = vmatprep.subr.bf16.mxu0 %v1632_v0 }
 0x13f   :  { %1393 = vmatpush3.bf16.msra.mxu0 %v1719_v7 }
 0x140   :  { %1394 = vmatprep.subr.bf16.mxu0 %v1632_v0 }
 0x143   :  { %1396 = vmatpush3.bf16.msra.mxu0 %v1724_v14 }
 0x144   :  { %1397 = vmatprep.subr.bf16.mxu0 %v1632_v0 }
 0x147   :  { %1399 = vmatpush3.bf16.msra.mxu0 %v1729_v18 }
 0x148   :  { %1400 = vmatprep.subr.bf16.mxu0 %v1632_v0 }
 0x14b   :  { %1402 = vmatpush3.bf16.msra.mxu0 %v1736_v21 }
 0x14c   :  { %1403 = vmatprep.subr.bf16.mxu0 %v1632_v0 }
 0x14f   :  { %1405 = vmatpush3.bf16.msra.mxu0 %v1742_v24 }
 0x150   :  { %1406 = vmatprep.subr.bf16.mxu0 %v1632_v0 }
 0x153   :  { %1408 = vmatpush3.bf16.msra.mxu0 %v1748_v27 }
 0x154   :  { %1409 = vmatprep.subr.bf16.mxu0 %v1632_v0 }
 0x157   :  { %1411 = vmatpush3.bf16.msra.mxu0 %v1754_v30 }
 0x158   :  { %1436 = vmatprep.subr.bf16.mxu0 %v1632_v0 }
 0x20d   :  { %v378_v52 = vpop.f32.mrb[8].mxu0 }
 0x20e   :  { %v382_v53 = vadd.f32 %v378_v52, %v178_v51  ;;  %v1101_v54 = vpop.f32.mrb[9].mxu0 }
 0x210   :  { %1519 = vtanh.f32 %v382_v53 }
 0x21a   :  { %v1520_v55 = vpop.eup %1519 }
 0x21b   :  { %385 = vst [vmem:[#allocation10 + $0x8] sm:$0xff] %v1520_v55  ;;  %1135 = vmatmul.mubr.f32.vlgmr.msra.gmra.mrb[2].mxu1 %v1520_v55 }
 0x21c   :  { %1414 = vmatpush3.bf16.msra.mxu1 %v1716_v5  ;;  %1204 = vmatprep.mubr.msk.f32.mxu1 %vm1633_vm0, %v1634_v1 }
 0x21d   :  { %1415 = vmatprep.subr.bf16.mxu1 %v1632_v0 }
 0x220   :  { %1417 = vmatpush3.bf16.msra.mxu1 %v1719_v7 }
 0x221   :  { %1418 = vmatprep.subr.bf16.mxu1 %v1632_v0 }
 0x224   :  { %1420 = vmatpush3.bf16.msra.mxu1 %v1724_v14 }
 0x225   :  { %1421 = vmatprep.subr.bf16.mxu1 %v1632_v0 }
 0x228   :  { %1423 = vmatpush3.bf16.msra.mxu1 %v1729_v18 }
 0x229   :  { %1424 = vmatprep.subr.bf16.mxu1 %v1632_v0 }
 0x22c   :  { %1426 = vmatpush3.bf16.msra.mxu1 %v1736_v21 }
 0x22d   :  { %1427 = vmatprep.subr.bf16.mxu1 %v1632_v0 }
 0x230   :  { %1429 = vmatpush3.bf16.msra.mxu1 %v1742_v24 }
 0x231   :  { %1430 = vmatprep.subr.bf16.mxu1 %v1632_v0 }
 0x234   :  { %1432 = vmatpush3.bf16.msra.mxu1 %v1748_v27 }
 0x235   :  { %1433 = vmatprep.subr.bf16.mxu1 %v1632_v0 }
 0x238   :  { %1435 = vmatpush3.bf16.msra.mxu1 %v1754_v30 }
 0x239   :  { %1460 = vmatprep.subr.bf16.mxu1 %v1632_v0 }
 0x2ee   :  { %v454_v57 = vpop.f32.mrb[2].mxu1 }
 0x2ef   :  { %v458_v58 = vadd.f32 %v454_v57, %v183_v56  ;;  %v1136_v59 = vpop.f32.mrb[3].mxu1 }
 0x2f1   :  { %1521 = vtanh.f32 %v458_v58 }
 0x2fb   :  { %v1522_v60 = vpop.eup %1521 }
 0x2fc   :  { %461 = vst [vmem:[#allocation10 + $0x10] sm:$0xff] %v1522_v60  ;;  %1170 = vmatmul.mubr.f32.vlgmr.msra.gmra.mrb[10].mxu0 %v1522_v60 }
 0x2fd   :  { %1438 = vmatpush3.bf16.msra.mxu0 %v1716_v5  ;;  %1239 = vmatprep.mubr.msk.f32.mxu0 %vm1633_vm0, %v1634_v1 }
 0x2fe   :  { %1439 = vmatprep.subr.bf16.mxu0 %v1632_v0 }
 0x301   :  { %1441 = vmatpush3.bf16.msra.mxu0 %v1719_v7 }
 0x302   :  { %1442 = vmatprep.subr.bf16.mxu0 %v1632_v0 }
 0x305   :  { %1444 = vmatpush3.bf16.msra.mxu0 %v1724_v14 }
 0x306   :  { %1445 = vmatprep.subr.bf16.mxu0 %v1632_v0 }
 0x309   :  { %1447 = vmatpush3.bf16.msra.mxu0 %v1729_v18 }
 0x30a   :  { %1448 = vmatprep.subr.bf16.mxu0 %v1632_v0 }
 0x30d   :  { %1450 = vmatpush3.bf16.msra.mxu0 %v1736_v21 }
 0x30e   :  { %1451 = vmatprep.subr.bf16.mxu0 %v1632_v0 }
 0x311   :  { %1453 = vmatpush3.bf16.msra.mxu0 %v1742_v24 }
 0x312   :  { %1454 = vmatprep.subr.bf16.mxu0 %v1632_v0 }
 0x315   :  { %1456 = vmatpush3.bf16.msra.mxu0 %v1748_v27 }
 0x316   :  { %1457 = vmatprep.subr.bf16.mxu0 %v1632_v0 }
 0x319   :  { %1459 = vmatpush3.bf16.msra.mxu0 %v1754_v30 }
 0x31a   :  { %1484 = vmatprep.subr.bf16.mxu0 %v1632_v0 }
 0x3cf   :  { %v530_v62 = vpop.f32.mrb[10].mxu0 }
 0x3d0   :  { %v534_v63 = vadd.f32 %v530_v62, %v188_v61  ;;  %v1171_v2 = vpop.f32.mrb[11].mxu0 }
 0x3d2   :  { %1523 = vtanh.f32 %v534_v63 }
 0x3dc   :  { %v1524_v3 = vpop.eup %1523 }
 0x3dd   :  { %537 = vst [vmem:[#allocation10 + $0x18] sm:$0xff] %v1524_v3  ;;  %1205 = vmatmul.mubr.f32.vlgmr.msra.gmra.mrb[4].mxu1 %v1524_v3 }
 0x3de   :  { %1462 = vmatpush3.bf16.msra.mxu1 %v1716_v5  ;;  %1274 = vmatprep.mubr.msk.f32.mxu1 %vm1633_vm0, %v1634_v1 }
 0x3df   :  { %1463 = vmatprep.subr.bf16.mxu1 %v1632_v0 }
 0x3e2   :  { %1465 = vmatpush3.bf16.msra.mxu1 %v1719_v7 }
 0x3e3   :  { %1466 = vmatprep.subr.bf16.mxu1 %v1632_v0 }
 0x3e6   :  { %1468 = vmatpush3.bf16.msra.mxu1 %v1724_v14 }
 0x3e7   :  { %1469 = vmatprep.subr.bf16.mxu1 %v1632_v0 }
 0x3ea   :  { %1471 = vmatpush3.bf16.msra.mxu1 %v1729_v18 }
 0x3eb   :  { %1472 = vmatprep.subr.bf16.mxu1 %v1632_v0 }
 0x3ee   :  { %1474 = vmatpush3.bf16.msra.mxu1 %v1736_v21 }
 0x3ef   :  { %1475 = vmatprep.subr.bf16.mxu1 %v1632_v0 }
 0x3f2   :  { %1477 = vmatpush3.bf16.msra.mxu1 %v1742_v24 }
 0x3f3   :  { %1478 = vmatprep.subr.bf16.mxu1 %v1632_v0 }
 0x3f6   :  { %1480 = vmatpush3.bf16.msra.mxu1 %v1748_v27 }
 0x3f7   :  { %1481 = vmatprep.subr.bf16.mxu1 %v1632_v0 }
 0x3fa   :  { %1483 = vmatpush3.bf16.msra.mxu1 %v1754_v30 }
 0x4b0   :  { %v606_v6 = vpop.f32.mrb[4].mxu1 }
 0x4b1   :  { %v610_v8 = vadd.f32 %v606_v6, %v193_v4  ;;  %v1206_v9 = vpop.f32.mrb[5].mxu1 }
 0x4b3   :  { %1525 = vtanh.f32 %v610_v8 }
 0x4bd   :  { %v1526_v10 = vpop.eup %1525 }
 0x4be   :  { %613 = vst [vmem:[#allocation10 + $0x20] sm:$0xff] %v1526_v10  ;;  %1240 = vmatmul.mubr.f32.vlgmr.msra.gmra.mrb[12].mxu0 %v1526_v10 }
 0x4bf   :  { %1486 = vmatpush3.bf16.msra.mxu0 %v1716_v5  ;;  %1309 = vmatprep.mubr.msk.f32.mxu0 %vm1633_vm0, %v1634_v1  ;;  %v198_v1 = vadd.f32 %v1818_v47, %v1797_v39 }
 0x4c0   :  { %1487 = vmatprep.subr.bf16.mxu0 %v1632_v0 }
 0x4c3   :  { %1489 = vmatpush3.bf16.msra.mxu0 %v1719_v7 }
 0x4c4   :  { %1490 = vmatprep.subr.bf16.mxu0 %v1632_v0 }
 0x4c7   :  { %1492 = vmatpush3.bf16.msra.mxu0 %v1724_v14 }
 0x4c8   :  { %1493 = vmatprep.subr.bf16.mxu0 %v1632_v0 }
 0x4cb   :  { %1495 = vmatpush3.bf16.msra.mxu0 %v1729_v18 }
 0x4cc   :  { %1496 = vmatprep.subr.bf16.mxu0 %v1632_v0 }
 0x4cf   :  { %1498 = vmatpush3.bf16.msra.mxu0 %v1736_v21 }
 0x4d0   :  { %1499 = vmatprep.subr.bf16.mxu0 %v1632_v0 }
 0x4d3   :  { %1501 = vmatpush3.bf16.msra.mxu0 %v1742_v24 }
 0x4d4   :  { %1502 = vmatprep.subr.bf16.mxu0 %v1632_v0 }
 0x4d7   :  { %1504 = vmatpush3.bf16.msra.mxu0 %v1748_v27 }
 0x4d8   :  { %1505 = vmatprep.subr.bf16.mxu0 %v1632_v0 }
 0x4db   :  { %1507 = vmatpush3.bf16.msra.mxu0 %v1754_v30 }
 0x591   :  { %v682_v5 = vpop.f32.mrb[12].mxu0 }
 0x592   :  { %v686_v7 = vadd.f32 %v682_v5, %v198_v1  ;;  %v1241_v11 = vpop.f32.mrb[13].mxu0 }
 0x594   :  { %1527 = vtanh.f32 %v686_v7 }
 0x59e   :  { %v1528_v12 = vpop.eup %1527 }
 0x59f   :  { %689 = vst [vmem:[#allocation10 + $0x28] sm:$0xff] %v1528_v12  ;;  %1275 = vmatmul.mubr.f32.vlgmr.msra.gmra.mrb[6].mxu1 %v1528_v12 }
 0x672   :  { %v758_v14 = vpop.f32.mrb[6].mxu1 }
 0x673   :  { %v762_v15 = vadd.f32 %v758_v14, %v203_v13  ;;  %v1276_v16 = vpop.f32.mrb[7].mxu1 }
 0x675   :  { %1529 = vtanh.f32 %v762_v15 }
 0x67f   :  { %v1530_v0 = vpop.eup %1529 }
 0x680   :  { %765 = vst [vmem:[#allocation10 + $0x30] sm:$0xff] %v1530_v0  ;;  %1310 = vmatmul.mubr.f32.vlgmr.msra.gmra.mrb[14].mxu0 %v1530_v0 }
 0x753   :  { %v834_v18 = vpop.f32.mrb[14].mxu0 }
 0x754   :  { %v838_v19 = vadd.f32 %v834_v18, %v208_v17  ;;  %v1311_v20 = vpop.f32.mrb[15].mxu0 }
 0x756   :  { %1531 = vtanh.f32 %v838_v19 }
 0x760   :  { %v1532_v21 = vpop.eup %1531 }
 0x761   :  { %841 = vst [vmem:[#allocation10 + $0x38] sm:$0xff] %v1532_v21 }
 0x762   :  { %1610 = shalt.err (!%p1607_p0)
}
 0x763   :  { %s1611_s6 = scalar_lea.hbm %s1926_s4, 1024 }
 0x764   :  { %p1612_p1 = scmp.ne.s32.totalorder %s1926_s4, %s1611_s6  ;;  %p1615_p2 = scmp.lt.u32.totalorder %s1611_s6, %s1926_s4 }
 0x766   :  { %p1617_p3 = pnand %p1615_p2, %p1612_p1 }
 0x768   :  { %1620 = shalt.err (!%p1617_p3)
}
 0x769   :  { %854 = dma.vmem_to_hbm [thread:$0]  %s849_s26, 1024, %s1926_s4, [#allocation6], %s1629_s27, %s1629_s27, %s1630_s28  }
 0x76a   :  { %1625 = dma.done.wait [#allocation6], 1024  }
 0x76b   :  { %1626 = vsyncadd [#allocation6], 4294966272 }
 0x76c   :  { %858 = vsyncpa [#allocation5], 1 }
 0x76d   :  { %859 = vsyncpa [#allocation8], 1 }
 0x76e   :  { %860 = vsyncpa [#allocation6], 1 }

</bundles_post_ra>
